<compile_context>
chip_gen: v7x
topology: tpu7x:2x2x1
jax: 0.10.0
libtpu: 0.0.40
codegen_flags: <defaults>
</compile_context>

<pallas_src>
import functools

import jax
import jax.numpy as jnp
from jax import lax
from jax.experimental import pallas as pl
from jax.experimental.pallas import tpu as pltpu


def _combined_kernel(logits_ref, targets_ref, num_ref, den_ref, bce_ref, *, dr, td):
    """One grid step processes a (rb, td) feature tile of a row block.

    Grid = (row_blocks, feature_tiles). The three (rb, 1) outputs are resident
    accumulators across the feature axis (same output block for every k).
    """
    k = pl.program_id(1)

    @pl.when(k == 0)
    def _():
        num_ref[...] = jnp.zeros_like(num_ref)
        den_ref[...] = jnp.zeros_like(den_ref)
        bce_ref[...] = jnp.zeros_like(bce_ref)

    x = logits_ref[...].astype(jnp.float32)
    t = targets_ref[...].astype(jnp.float32)

    # 2 EUP ops per element:
    #   sigmoid(x)         = 0.5 * tanh(x/2) + 0.5
    #   log(1 + exp(-|x|)) = -log(0.5 * |tanh(x/2)| + 0.5)
    th = jnp.tanh(0.5 * x)
    probs = 0.5 * th + 0.5
    log_term = -jnp.log(0.5 * jnp.abs(th) + 0.5)
    bce = jnp.maximum(x, 0.0) - x * t + log_term

    pt = probs * t      # dice numerator terms
    ps = probs + t      # dice denominator terms

    def accumulate(pt_v, ps_v, bce_v):
        # Cross-lane reductions go to the XLU slot; accumulator traffic is (rb, 1) only.
        num_ref[...] += jnp.sum(pt_v, axis=-1, keepdims=True)
        den_ref[...] += jnp.sum(ps_v, axis=-1, keepdims=True)
        bce_ref[...] += jnp.sum(bce_v, axis=-1, keepdims=True)

    rem = dr % td  # static: ragged last tile only when != 0
    if rem == 0:
        accumulate(pt, ps, bce)
    else:
        last = pl.num_programs(1) - 1

        @pl.when(k < last)
        def _():
            accumulate(pt, ps, bce)

        @pl.when(k == last)
        def _():
            # Mask columns beyond the real feature extent (OOB-padded garbage is
            # discarded by the select before it can reach the sums).
            col = lax.broadcasted_iota(jnp.int32, pt.shape, 1)
            valid = col < rem
            accumulate(jnp.where(valid, pt, 0.0),
                       jnp.where(valid, ps, 0.0),
                       jnp.where(valid, bce, 0.0))


def combined_loss(logits, targets, *, alpha=0.5, eps=1e-7,
                  vmem_target_bytes=24 * 1024 * 1024, max_block_rows=1024):
    """Pallas CombinedLoss. logits/targets: (N, C, H, W) -> scalar float32."""
    assert logits.shape == targets.shape
    n = logits.shape[0]
    d = 1
    for s in logits.shape[1:]:
        d *= s

    # Sublane-dense reshape: split each sample into r sub-rows (prefer r=8 so tiny
    # batches still fill full (8,128) vregs).
    r = 1
    for cand in (8, 4, 2):
        if d % cand == 0:
            r = cand
            break
    rows = n * r
    dr = d // r

    lf = logits.reshape(rows, dr)       # native dtype, free reshape
    tf = targets.reshape(rows, dr)

    # Row blocking keeps the working set bounded for any batch size.
    rb = rows if rows <= max_block_rows else max_block_rows
    row_blocks = pl.cdiv(rows, rb)

    # Tile width from the VMEM budget: 2 inputs x 2 pipeline buffers (no wide scratch).
    per_col = rb * 2 * (logits.dtype.itemsize + targets.dtype.itemsize)
    td_budget = max(128, (vmem_target_bytes // per_col) // 128 * 128)
    if dr >= 128:
        td = min(td_budget, (dr // 128) * 128)   # lane-dense, never wider than the array
    else:
        td = dr                                   # tiny feature dim: one full block
    tiles = pl.cdiv(dr, td)

    kernel = functools.partial(_combined_kernel, dr=dr, td=td)
    out_sds = jax.ShapeDtypeStruct((rows, 1), jnp.float32)

    num_p, den_p, bce_p = pl.pallas_call(
        kernel,
        out_shape=(out_sds, out_sds, out_sds),
        grid_spec=pltpu.PrefetchScalarGridSpec(
            num_scalar_prefetch=0,
            grid=(row_blocks, tiles),
            in_specs=[
                pl.BlockSpec((rb, td), lambda i, k: (i, k)),
                pl.BlockSpec((rb, td), lambda i, k: (i, k)),
            ],
            out_specs=[
                pl.BlockSpec((rb, 1), lambda i, k: (i, 0)),
                pl.BlockSpec((rb, 1), lambda i, k: (i, 0)),
                pl.BlockSpec((rb, 1), lambda i, k: (i, 0)),
            ],
        ),
        compiler_params=pltpu.CompilerParams(
            dimension_semantics=("parallel", "arbitrary"),
            vmem_limit_bytes=48 * 1024 * 1024,
        ),
    )(lf, tf)

    # Tiny final combine in plain JAX (per-sample dice + global BCE mean).
    num_s = num_p[:, 0].reshape(n, r).sum(axis=1)
    den_s = den_p[:, 0].reshape(n, r).sum(axis=1)
    bce_total = bce_p.sum()

    dice = (2.0 * num_s + eps) / (den_s + eps)
    dice_loss = 1.0 - jnp.mean(dice)
    bce_loss = bce_total / (n * d)
    return alpha * dice_loss + (1.0 - alpha) * bce_loss


def _combined_loss_ref(logits, targets, alpha=0.5, eps=1e-7):
    x = logits.astype(jnp.float32)
    t = targets.astype(jnp.float32)
    probs = jax.nn.sigmoid(x)
    num = 2.0 * jnp.sum(probs * t, axis=(1, 2, 3)) + eps
    den = jnp.sum(probs + t, axis=(1, 2, 3)) + eps
    dice_loss = 1.0 - jnp.mean(num / den)
    bce = jnp.maximum(x, 0.0) - x * t + jnp.log1p(jnp.exp(-jnp.abs(x)))
    bce_loss = jnp.mean(bce)
    return alpha * dice_loss + (1.0 - alpha) * bce_loss


if __name__ == "__main__":
    key = jax.random.PRNGKey(0)
    k1, k2 = jax.random.split(key)
    N, C, H, W = 2, 4, 16, 16
    logits = jax.random.normal(k1, (N, C, H, W), dtype=jnp.float32)
    targets = (jax.random.uniform(k2, (N, C, H, W)) > 0.5).astype(jnp.float32)

    loss_fn = jax.jit(combined_loss)
    loss = loss_fn(logits, targets)
    loss = jax.block_until_ready(loss)

    ref = _combined_loss_ref(logits, targets)
    assert jnp.allclose(loss, ref, atol=2e-3, rtol=2e-3), (loss, ref)
    print("KERNEL_OK")
</pallas_src>

<mosaic_0001>
module attributes {stable_mosaic.version = 11 : i64} {
  func.func @_combined_kernel(%arg0: i32, %arg1: i32, %arg2: memref<16x128xf32, #tpu.memory_space<vmem>>, %arg3: memref<16x128xf32, #tpu.memory_space<vmem>>, %arg4: memref<16x1xf32, #tpu.memory_space<vmem>>, %arg5: memref<16x1xf32, #tpu.memory_space<vmem>>, %arg6: memref<16x1xf32, #tpu.memory_space<vmem>>) attributes {dimension_semantics = [#tpu.dimension_semantics<parallel>, #tpu.dimension_semantics<arbitrary>], iteration_bounds = array<i64: 1, 1>, scalar_prefetch = 0 : i64, scratch_operands = 0 : i64, tpu.core_type = #tpu.core_type<tc>, window_params = [{transform_indices = @transform_0, window_bounds = array<i64: 16, 128>}, {transform_indices = @transform_1, window_bounds = array<i64: 16, 128>}, {transform_indices = @transform_2, window_bounds = array<i64: 16, 1>}, {transform_indices = @transform_3, window_bounds = array<i64: 16, 1>}, {transform_indices = @transform_4, window_bounds = array<i64: 16, 1>}]} {
    %c0_i32 = arith.constant 0 : i32
    %0 = arith.cmpi eq, %arg1, %c0_i32 : i32
    %1 = arith.extui %0 : i1 to i32
    %c0_i32_0 = arith.constant 0 : i32
    %2 = arith.cmpi ne, %1, %c0_i32_0 : i32
    scf.if %2 {
      %cst_25 = arith.constant 0.000000e+00 : f32
      %42 = vector.broadcast %cst_25 : f32 to vector<16x1xf32>
      %c0_26 = arith.constant 0 : index
      %c0_27 = arith.constant 0 : index
      %43 = vector.load %arg4[%c0_26, %c0_27] : memref<16x1xf32, #tpu.memory_space<vmem>>, vector<16x1xf32>
      tpu.vector_store %arg4[%c0_26, %c0_27], %42 {strides = array<i32>} : memref<16x1xf32, #tpu.memory_space<vmem>>, vector<16x1xf32>,
      %cst_28 = arith.constant 0.000000e+00 : f32
      %44 = vector.broadcast %cst_28 : f32 to vector<16x1xf32>
      %c0_29 = arith.constant 0 : index
      %c0_30 = arith.constant 0 : index
      %45 = vector.load %arg5[%c0_29, %c0_30] : memref<16x1xf32, #tpu.memory_space<vmem>>, vector<16x1xf32>
      tpu.vector_store %arg5[%c0_29, %c0_30], %44 {strides = array<i32>} : memref<16x1xf32, #tpu.memory_space<vmem>>, vector<16x1xf32>,
      %cst_31 = arith.constant 0.000000e+00 : f32
      %46 = vector.broadcast %cst_31 : f32 to vector<16x1xf32>
      %c0_32 = arith.constant 0 : index
      %c0_33 = arith.constant 0 : index
      %47 = vector.load %arg6[%c0_32, %c0_33] : memref<16x1xf32, #tpu.memory_space<vmem>>, vector<16x1xf32>
      tpu.vector_store %arg6[%c0_32, %c0_33], %46 {strides = array<i32>} : memref<16x1xf32, #tpu.memory_space<vmem>>, vector<16x1xf32>,
    } else {
    }
    %c0 = arith.constant 0 : index
    %c0_1 = arith.constant 0 : index
    %3 = vector.load %arg2[%c0, %c0_1] : memref<16x128xf32, #tpu.memory_space<vmem>>, vector<16x128xf32>
    %c0_2 = arith.constant 0 : index
    %c0_3 = arith.constant 0 : index
    %4 = vector.load %arg3[%c0_2, %c0_3] : memref<16x128xf32, #tpu.memory_space<vmem>>, vector<16x128xf32>
    %cst = arith.constant 5.000000e-01 : f32
    %5 = vector.broadcast %cst : f32 to vector<16x128xf32>
    %6 = arith.mulf %5, %3 : vector<16x128xf32>
    %7 = math.tanh %6 : vector<16x128xf32>
    %cst_4 = arith.constant 5.000000e-01 : f32
    %8 = vector.broadcast %cst_4 : f32 to vector<16x128xf32>
    %9 = arith.mulf %8, %7 : vector<16x128xf32>
    %cst_5 = arith.constant 5.000000e-01 : f32
    %10 = vector.broadcast %cst_5 : f32 to vector<16x128xf32>
    %11 = arith.addf %9, %10 : vector<16x128xf32>
    %12 = math.absf %7 : vector<16x128xf32>
    %cst_6 = arith.constant 5.000000e-01 : f32
    %13 = vector.broadcast %cst_6 : f32 to vector<16x128xf32>
    %14 = arith.mulf %13, %12 : vector<16x128xf32>
    %cst_7 = arith.constant 5.000000e-01 : f32
    %15 = vector.broadcast %cst_7 : f32 to vector<16x128xf32>
    %16 = arith.addf %14, %15 : vector<16x128xf32>
    %17 = math.log %16 : vector<16x128xf32>
    %cst_8 = arith.constant 0.000000e+00 : f32
    %18 = vector.broadcast %cst_8 : f32 to vector<16x128xf32>
    %19 = arith.subf %18, %17 : vector<16x128xf32>
    %cst_9 = arith.constant 0.000000e+00 : f32
    %20 = vector.broadcast %cst_9 : f32 to vector<16x128xf32>
    %21 = arith.maximumf %3, %20 : vector<16x128xf32>
    %22 = arith.mulf %3, %4 : vector<16x128xf32>
    %23 = arith.subf %21, %22 : vector<16x128xf32>
    %24 = arith.addf %23, %19 : vector<16x128xf32>
    %25 = arith.mulf %11, %4 : vector<16x128xf32>
    %26 = arith.addf %11, %4 : vector<16x128xf32>
    %c0_10 = arith.constant 0 : index
    %c0_11 = arith.constant 0 : index
    %27 = vector.load %arg4[%c0_10, %c0_11] : memref<16x1xf32, #tpu.memory_space<vmem>>, vector<16x1xf32>
    %cst_12 = arith.constant dense<0.000000e+00> : vector<16xf32>
    %28 = vector.multi_reduction <add>, %25, %cst_12 [1] : vector<16x128xf32> to vector<16xf32>
    %29 = vector.shape_cast %28 : vector<16xf32> to vector<16x1xf32>
    %30 = arith.addf %27, %29 : vector<16x1xf32>
    %c0_13 = arith.constant 0 : index
    %c0_14 = arith.constant 0 : index
    %31 = vector.load %arg4[%c0_13, %c0_14] : memref<16x1xf32, #tpu.memory_space<vmem>>, vector<16x1xf32>
    tpu.vector_store %arg4[%c0_13, %c0_14], %30 {strides = array<i32>} : memref<16x1xf32, #tpu.memory_space<vmem>>, vector<16x1xf32>,
    %c0_15 = arith.constant 0 : index
    %c0_16 = arith.constant 0 : index
    %32 = vector.load %arg5[%c0_15, %c0_16] : memref<16x1xf32, #tpu.memory_space<vmem>>, vector<16x1xf32>
    %cst_17 = arith.constant dense<0.000000e+00> : vector<16xf32>
    %33 = vector.multi_reduction <add>, %26, %cst_17 [1] : vector<16x128xf32> to vector<16xf32>
    %34 = vector.shape_cast %33 : vector<16xf32> to vector<16x1xf32>
    %35 = arith.addf %32, %34 : vector<16x1xf32>
    %c0_18 = arith.constant 0 : index
    %c0_19 = arith.constant 0 : index
    %36 = vector.load %arg5[%c0_18, %c0_19] : memref<16x1xf32, #tpu.memory_space<vmem>>, vector<16x1xf32>
    tpu.vector_store %arg5[%c0_18, %c0_19], %35 {strides = array<i32>} : memref<16x1xf32, #tpu.memory_space<vmem>>, vector<16x1xf32>,
    %c0_20 = arith.constant 0 : index
    %c0_21 = arith.constant 0 : index
    %37 = vector.load %arg6[%c0_20, %c0_21] : memref<16x1xf32, #tpu.memory_space<vmem>>, vector<16x1xf32>
    %cst_22 = arith.constant dense<0.000000e+00> : vector<16xf32>
    %38 = vector.multi_reduction <add>, %24, %cst_22 [1] : vector<16x128xf32> to vector<16xf32>
    %39 = vector.shape_cast %38 : vector<16xf32> to vector<16x1xf32>
    %40 = arith.addf %37, %39 : vector<16x1xf32>
    %c0_23 = arith.constant 0 : index
    %c0_24 = arith.constant 0 : index
    %41 = vector.load %arg6[%c0_23, %c0_24] : memref<16x1xf32, #tpu.memory_space<vmem>>, vector<16x1xf32>
    tpu.vector_store %arg6[%c0_23, %c0_24], %40 {strides = array<i32>} : memref<16x1xf32, #tpu.memory_space<vmem>>, vector<16x1xf32>,
    return
  }
  func.func @transform_0(%arg0: i32, %arg1: i32) -> (i32, i32) {
    %c0_i32 = arith.constant 0 : i32
    return %arg0, %arg1 : i32, i32
  }
  func.func @transform_1(%arg0: i32, %arg1: i32) -> (i32, i32) {
    %c0_i32 = arith.constant 0 : i32
    return %arg0, %arg1 : i32, i32
  }
  func.func @transform_2(%arg0: i32, %arg1: i32) -> (i32, i32) {
    %c0_i32 = arith.constant 0 : i32
    %c0_i32_0 = arith.constant 0 : i32
    return %arg0, %c0_i32 : i32, i32
  }
  func.func @transform_3(%arg0: i32, %arg1: i32) -> (i32, i32) {
    %c0_i32 = arith.constant 0 : i32
    %c0_i32_0 = arith.constant 0 : i32
    return %arg0, %c0_i32 : i32, i32
  }
  func.func @transform_4(%arg0: i32, %arg1: i32) -> (i32, i32) {
    %c0_i32 = arith.constant 0 : i32
    %c0_i32_0 = arith.constant 0 : i32
    return %arg0, %c0_i32 : i32, i32
  }
}

</mosaic_0001>

<bundles_post_ra>
// kernel: squeeze.3
= control target key start
LH: loop header
LB: loop body
LE: loop exit
PB: predicated region body
PF: predicated region fallthrough
CT: control target
= control target key end

     0   :  { %vm7_vm0 = vcmask 64512   ;;  %s39_s0 = inlined_call_operand.vmem [shape: f32[16], index: 0, kind: input, shape index: {}]   ;;  %s40_s1 = inlined_call_operand.vmem [shape: f32[2,8], index: 1, kind: output, shape index: {}]  }
   0x1   :  { %v4_v0 = vld [vmem:[%s39_s0] sm:$0x1]  ;;  %s22_s0 = smov 120  }
   0x2   :  { %5 = vst [vmem:[#allocation1] sm:$0x1] %v4_v0 }
   0x9   :  { %v9_v1 = vld [vmem:[#allocation1] sm:$0x1]  }
   0xa   :  { %v6_v2 = vld [vmem:[#allocation1] sm:$0x1]   ;;  %10 = vrot.lane.b32.xlu0 %v9_v1, %s22_s0 }
   0xb   :  { %8 = vst.msk [vmem:[#allocation0] sm:$0x1] %vm7_vm0, %v6_v2  }
  0x7c   :  { %v11_v3 = vpop.permute.xlu0 %10  }
  0x7d   :  { %14 = vst.msk [vmem:[#allocation0 + $0x1] sm:$0x1] %vm7_vm0, %v11_v3  }
  0x84   :  { %v18_v4 = vld [vmem:[#allocation0] sm:$0x3] }
  0x85   :  { %20 = vst [vmem:[%s40_s1] sm:$0x3] %v18_v4 }

// kernel: combined_loss.1
= control target key start
LH: loop header
LB: loop body
LE: loop exit
PB: predicated region body
PF: predicated region fallthrough
CT: control target
= control target key end

     0   :  { %vm18_vm0 = vcmask 7168   ;;  %v113_v2 = vmov 0.0   ;;  %s217_s0 = inlined_call_operand.vmem [shape: f32[16,128], index: 0, kind: input, shape index: {}]   ;;  %s218_s3 = inlined_call_operand.vmem [shape: f32[16,1], index: 3, kind: output, shape index: {1}]   ;;  %s219_s1 = inlined_call_operand.vmem [shape: f32[16,128], index: 1, kind: input, shape index: {}]   ;;  %s220_s2 = inlined_call_operand.vmem [shape: f32[16,1], index: 2, kind: output, shape index: {0}]   ;;  %s221_s4 = inlined_call_operand.vmem [shape: f32[16,1], index: 4, kind: output, shape index: {2}]  }
   0x1   :  { %v25_v0 = vld [vmem:[%s217_s0] sm:$0xff]  ;;  %v26_v1 = vld [vmem:[%s217_s0 + $0x8] sm:$0xff]  ;;  %21 = vst.msk [vmem:[%s218_s3] sm:$0xff] %vm18_vm0, %v113_v2  ;;  %22 = vst.msk [vmem:[%s218_s3 + $0x8] sm:$0xff] %vm18_vm0, %v113_v2 }
   0x2   :  { %v29_v3 = vmul.f32 0.5, %v25_v0  ;;  %v30_v4 = vmul.f32 0.5, %v26_v1  ;;  %v27_v9 = vld [vmem:[%s219_s1] sm:$0xff]  ;;  %v28_v14 = vld [vmem:[%s219_s1 + $0x8] sm:$0xff]  ;;  %v49_v24 = vmax.f32 %v25_v0, 0.0  ;;  %v50_v25 = vmax.f32 %v26_v1, 0.0 }
   0x3   :  { %v51_v23 = vmul.f32 %v27_v9, %v25_v0  ;;  %v52_v26 = vmul.f32 %v28_v14, %v26_v1  ;;  %19 = vst.msk [vmem:[%s220_s2] sm:$0xff] %vm18_vm0, %v113_v2  ;;  %20 = vst.msk [vmem:[%s220_s2 + $0x8] sm:$0xff] %vm18_vm0, %v113_v2 }
   0x4   :  { %105 = vtanh.f32 %v29_v3  ;;  %24 = vst.msk [vmem:[%s221_s4 + $0x8] sm:$0xff] %vm18_vm0, %v113_v2  ;;  %23 = vst.msk [vmem:[%s221_s4] sm:$0xff] %vm18_vm0, %v113_v2 }
   0x5   :  { %107 = vtanh.f32 %v30_v4  ;;  %v53_v30 = vsub.f32 %v49_v24, %v51_v23  ;;  %v54_v32 = vsub.f32 %v50_v25, %v52_v26 }
   0x8   :  { %v72_v37 = vld [vmem:[%s218_s3] sm:$0xff]  ;;  %v73_v43 = vld [vmem:[%s218_s3 + $0x8] sm:$0xff] }
   0xa   :  { %v61_v38 = vld [vmem:[%s220_s2] sm:$0xff]  ;;  %v62_v44 = vld [vmem:[%s220_s2 + $0x8] sm:$0xff] }
   0xb   :  { %v82_v49 = vld [vmem:[%s221_s4] sm:$0xff]  ;;  %v83_v50 = vld [vmem:[%s221_s4 + $0x8] sm:$0xff] }
   0xe   :  { %v106_v5 = vpop.eup %105 }
   0xf   :  { %v108_v6 = vpop.eup %107  ;;  %v33_v7 = vmul.f32 0.5, %v106_v5  ;;  %v37_v8 = vand.u32 2147483647, %v106_v5 }
  0x10   :  { %v34_v10 = vmul.f32 0.5, %v108_v6  ;;  %v38_v11 = vand.u32 2147483647, %v108_v6 }
  0x11   :  { %v35_v12 = vadd.f32 0.5, %v33_v7  ;;  %v39_v13 = vmul.f32 0.5, %v37_v8 }
  0x12   :  { %v36_v15 = vadd.f32 0.5, %v34_v10  ;;  %v40_v16 = vmul.f32 0.5, %v38_v11 }
  0x13   :  { %v59_v17 = vadd.f32 %v35_v12, %v27_v9  ;;  %v57_v18 = vmul.f32 %v35_v12, %v27_v9  ;;  %v41_v19 = vadd.f32 0.5, %v39_v13 }
  0x14   :  { %v42_v20 = vadd.f32 0.5, %v40_v16  ;;  %v60_v21 = vadd.f32 %v36_v15, %v28_v14  ;;  %v58_v22 = vmul.f32 %v36_v15, %v28_v14 }
  0x15   :  { %74 = vadd.xlane.f32.xlu1 %v59_v17  ;;  %63 = vadd.xlane.f32.xlu0 %v57_v18  ;;  %109 = vlog2.f32 %v41_v19 }
  0x16   :  { %111 = vlog2.f32 %v42_v20 }
  0x19   :  { %76 = vadd.xlane.f32.xlu1 %v60_v21  ;;  %65 = vadd.xlane.f32.xlu0 %v58_v22 }
  0x1f   :  { %v110_v27 = vpop.eup %109 }
  0x20   :  { %v112_v28 = vpop.eup %111  ;;  %v44_v29 = vmul.f32 0.6931472, %v110_v27 }
  0x21   :  { %v46_v31 = vmul.f32 0.6931472, %v112_v28 }
  0x22   :  { %v47_v33 = vsub.f32 0.0, %v44_v29 }
  0x23   :  { %v48_v34 = vsub.f32 0.0, %v46_v31 }
  0x24   :  { %v55_v35 = vadd.f32 %v53_v30, %v47_v33 }
  0x25   :  { %v56_v36 = vadd.f32 %v54_v32, %v48_v34 }
  0x26   :  { %84 = vadd.xlane.f32.xlu0 %v55_v35 }
  0x27   :  { %86 = vadd.xlane.f32.xlu1 %v56_v36 }
  0xa2   :  { %v75_v39 = vpop.xlane.xlu1 %74  ;;  %v64_v40 = vpop.xlane.xlu0 %63 }
  0xa3   :  { %v78_v41 = vadd.f32 %v75_v39, %v72_v37  ;;  %v67_v42 = vadd.f32 %v64_v40, %v61_v38 }
  0xa5   :  { %80 = vst.msk [vmem:[%s218_s3] sm:$0xff] %vm18_vm0, %v78_v41  ;;  %70 = vst.msk [vmem:[%s220_s2] sm:$0xff] %vm18_vm0, %v67_v42 }
  0xa6   :  { %v77_v45 = vpop.xlane.xlu1 %76  ;;  %v66_v46 = vpop.xlane.xlu0 %65 }
  0xa7   :  { %v79_v47 = vadd.f32 %v77_v45, %v73_v43  ;;  %v68_v48 = vadd.f32 %v66_v46, %v62_v44 }
  0xa9   :  { %81 = vst.msk [vmem:[%s218_s3 + $0x8] sm:$0xff] %vm18_vm0, %v79_v47  ;;  %71 = vst.msk [vmem:[%s220_s2 + $0x8] sm:$0xff] %vm18_vm0, %v68_v48 }
  0xb3   :  { %v85_v51 = vpop.xlane.xlu0 %84 }
  0xb4   :  { %v87_v52 = vpop.xlane.xlu1 %86  ;;  %v88_v53 = vadd.f32 %v85_v51, %v82_v49 }
  0xb5   :  { %v89_v54 = vadd.f32 %v87_v52, %v83_v50 }
  0xb6   :  { %90 = vst.msk [vmem:[%s221_s4] sm:$0xff] %vm18_vm0, %v88_v53 }
  0xb7   :  { %91 = vst.msk [vmem:[%s221_s4 + $0x8] sm:$0xff] %vm18_vm0, %v89_v54 }

</bundles_post_ra>
